<compile_context>
chip_gen: v6e
topology: v6e:2x2x1
jax: 0.10.0
libtpu: 0.0.40
codegen_flags: <defaults>
</compile_context>

<pallas_src>
import functools

import jax
import jax.numpy as jnp
from jax.experimental import pallas as pl
from jax.experimental.pallas import tpu as pltpu

_EPS = 1e-6        # matches F.pairwise_distance default eps
_NUM_CORES = 2     # leading "parallel" grid axis (uses both v7x TensorCores)
_LANE = 128
_SUBLANE = 8


def _round_up(x, m):
    return ((x + m - 1) // m) * m


def _contrastive_loss_kernel(x1_ref, x2_ref, label_ref, seg_ref, out_ref, *,
                             margin, n_total, tile_n, fold_k, tiles_per_core):
    c = pl.program_id(0)          # "parallel" core axis
    i = pl.program_id(1)          # "arbitrary" per-core reduction axis

    # Per-core accumulator = the resident output block; init on the first step.
    @pl.when(i == 0)
    def _():
        out_ref[...] = jnp.zeros_like(out_ref)

    # DMA'd in native dtype; upcast in-register.
    x1 = x1_ref[...].astype(jnp.float32)          # (tile_n, Df)
    x2 = x2_ref[...].astype(jnp.float32)          # (tile_n, Df)
    label = label_ref[...].astype(jnp.float32)    # (tile_n, k)
    seg = seg_ref[...]                            # (Df, k) constant 0/1 segment matrix

    # F.pairwise_distance: ||x1 - x2 + eps||_2 per original row (= per D-wide segment).
    diff = (x1 - x2) + jnp.float32(_EPS)
    # Segmented lane-reduce on the (otherwise idle) MXU: (tile_n, Df) @ (Df, k).
    dist_sq = jnp.dot(diff * diff, seg,
                      preferred_element_type=jnp.float32,
                      precision=jax.lax.Precision.HIGHEST)     # (tile_n, k)
    dist = jnp.sqrt(dist_sq)
    hinge = jnp.maximum(jnp.float32(margin) - dist, 0.0)
    # Keep the exact reference formula (labels need not be strictly binary).
    loss = label * dist_sq + (1.0 - label) * (hinge * hinge)   # (tile_n, k)

    # Global (folded) tile index.  On the last core it may exceed the last valid
    # tile (the DMA index_map clamps); such tiles are fully masked below.
    t = c * tiles_per_core + i
    needs_mask = (t + 1) * (tile_n * fold_k) > n_total

    @pl.when(needs_mask)          # tail tile / fold padding / duplicate tile only
    def _():
        rows = jax.lax.broadcasted_iota(jnp.int32, loss.shape, 0)
        subs = jax.lax.broadcasted_iota(jnp.int32, loss.shape, 1)
        orig_row = (t * tile_n + rows) * fold_k + subs
        masked = jnp.where(orig_row < n_total, loss, 0.0)
        out_ref[...] += jnp.sum(masked).reshape(out_ref.shape)

    @pl.when(jnp.logical_not(needs_mask))
    def _():
        out_ref[...] += jnp.sum(loss).reshape(out_ref.shape)


def _vmem_capacity_bytes():
    try:
        return int(pltpu.get_tpu_info().vmem_capacity_bytes)
    except Exception:
        return 64 * 1024 * 1024   # conservative fallback (v7x per-core VMEM)


def contrastive_loss(x1, x2, label, margin: float = 1.0, tile_n: int | None = None):
    """Pallas TPU ContrastiveLoss.forward.

    x1, x2: (N, D) float arrays (any float dtype; upcast to f32 in-kernel).
    label:  (N,) array (typically {0,1}).  Returns a scalar float32 loss.
    """
    n, d = x1.shape
    assert x2.shape == (n, d), (x1.shape, x2.shape)
    label = label.reshape(-1)
    assert label.shape == (n,)

    # Fold k consecutive rows into one lane-dense row when D < 128 (k*D <= 128).
    fold_k = max(1, _LANE // d)
    nf = pl.cdiv(n, fold_k)
    if fold_k > 1:
        pad = nf * fold_k - n
        if pad:
            # TODO(synk): this pad copies the inputs once in HBM; callers with huge N
            # should keep N % (128 // D) == 0 so the fold is a free reshape.
            x1 = jnp.pad(x1, ((0, pad), (0, 0)))
            x2 = jnp.pad(x2, ((0, pad), (0, 0)))
            label = jnp.pad(label, (0, pad))
        x1f = x1.reshape(nf, fold_k * d)
        x2f = x2.reshape(nf, fold_k * d)
        labelf = label.reshape(nf, fold_k)
    else:
        x1f, x2f, labelf = x1, x2, label.reshape(nf, 1)
    df = x1f.shape[1]

    # Constant 0/1 segment matrix: column s sums features [s*D, (s+1)*D).
    seg = (jnp.arange(df, dtype=jnp.int32)[:, None] // d
           == jnp.arange(fold_k, dtype=jnp.int32)[None, :]).astype(jnp.float32)

    # --- Tile-size heuristic & VMEM accounting with lane-padded block sizes. ---
    in_item = jnp.dtype(x1f.dtype).itemsize
    lab_item = jnp.dtype(labelf.dtype).itemsize
    df_pad = _round_up(df, _LANE)      # x1/x2 VMEM blocks are lane-padded to 128
    lab_pad = _LANE                    # (tile, k) label block is lane-padded to 128
    per_row_dbuf = 2 * (2 * df_pad * in_item + lab_pad * lab_item)  # x 2 buffers
    cap = _vmem_capacity_bytes()
    if tile_n is None:
        budget = min(12 * 1024 * 1024, cap // 5)   # double-buffered input budget
        tile_n = max(8, min(1024, budget // max(per_row_dbuf, 1)))
    tile_n = max(_SUBLANE, (min(tile_n, _round_up(nf, _SUBLANE)) // _SUBLANE) * _SUBLANE)

    tiles_total = pl.cdiv(nf, tile_n)
    tiles_per_core = pl.cdiv(tiles_total, _NUM_CORES)
    grid = (_NUM_CORES, tiles_per_core)

    dbuf_bytes = tile_n * per_row_dbuf
    seg_bytes = 2 * _round_up(df, _SUBLANE) * _LANE * 4
    vmem_limit = int(min(max(dbuf_bytes + seg_bytes + (2 << 20), 8 << 20), cap))

    def _row_map(c, i):
        # Clamp so the DMA never starts past the last valid tile; duplicate tiles
        # on the last core are zeroed by the in-kernel mask.
        return (jnp.minimum(c * tiles_per_core + i, tiles_total - 1), 0)

    kernel = functools.partial(
        _contrastive_loss_kernel, margin=float(margin), n_total=n, tile_n=tile_n,
        fold_k=fold_k, tiles_per_core=tiles_per_core)

    # NOTE: per-core running f32 sum; for N in the many-millions consider a wider
    # partial-sum accumulator, but f32 is ample for typical batch sizes.
    partial_sums = pl.pallas_call(
        kernel,
        out_shape=jax.ShapeDtypeStruct((_NUM_CORES, 1, 1), jnp.float32),
        grid=grid,
        in_specs=[
            pl.BlockSpec((tile_n, df), _row_map),
            pl.BlockSpec((tile_n, df), _row_map),
            pl.BlockSpec((tile_n, fold_k), _row_map),
            pl.BlockSpec((df, fold_k), lambda c, i: (0, 0)),   # resident constant
        ],
        out_specs=pl.BlockSpec((1, 1, 1), lambda c, i: (c, 0, 0)),
        compiler_params=pltpu.CompilerParams(
            dimension_semantics=("parallel", "arbitrary"),
            vmem_limit_bytes=vmem_limit,
        ),
    )(x1f, x2f, labelf, seg)

    return jnp.sum(partial_sums) / jnp.float32(n)


def _reference(x1, x2, label, margin=1.0):
    # Pure-JAX reference mirroring the PyTorch semantics.
    diff = x1.astype(jnp.float32) - x2.astype(jnp.float32) + jnp.float32(_EPS)
    dist = jnp.sqrt(jnp.sum(diff * diff, axis=-1))
    lbl = label.astype(jnp.float32).reshape(-1)
    loss = lbl * dist ** 2 + (1.0 - lbl) * jnp.maximum(margin - dist, 0.0) ** 2
    return jnp.mean(loss)


if __name__ == "__main__":
    key = jax.random.PRNGKey(0)
    k1, k2, k3, k4 = jax.random.split(key, 4)

    # 1) Lane-folded path (D=32 -> 4 rows per 128-lane row), exact tiles.
    N, D = 64, 32
    x1 = jax.random.normal(k1, (N, D), dtype=jnp.float32)
    x2 = jax.random.normal(k2, (N, D), dtype=jnp.float32)
    label = jax.random.bernoulli(k3, p=0.5, shape=(N,)).astype(jnp.float32)
    out1 = jax.block_until_ready(contrastive_loss(x1, x2, label, margin=1.0))
    ref1 = _reference(x1, x2, label, 1.0)
    assert jnp.allclose(out1, ref1, rtol=1e-4, atol=1e-4), (out1, ref1)

    # 2) Non-dividing D (48 -> fold 2, 96 lanes), row padding + tail tile, explicit tile_n.
    ka, kb, kc = jax.random.split(k4, 3)
    N2, D2 = 101, 48
    a = jax.random.normal(ka, (N2, D2), dtype=jnp.float32)
    b = jax.random.normal(kb, (N2, D2), dtype=jnp.float32)
    y = jax.random.bernoulli(kc, p=0.5, shape=(N2,)).astype(jnp.float32)
    out2 = jax.block_until_ready(contrastive_loss(a, b, y, margin=1.0, tile_n=32))
    ref2 = _reference(a, b, y, 1.0)
    assert jnp.allclose(out2, ref2, rtol=1e-4, atol=1e-4), (out2, ref2)

    # 3) Unfolded path (D >= 128) with bf16 inputs upcast in-kernel.
    kd, ke, kf = jax.random.split(kc, 3)
    N3, D3 = 40, 160
    p = jax.random.normal(kd, (N3, D3), dtype=jnp.bfloat16)
    q = jax.random.normal(ke, (N3, D3), dtype=jnp.bfloat16)
    z = jax.random.bernoulli(kf, p=0.5, shape=(N3,)).astype(jnp.float32)
    out3 = jax.block_until_ready(contrastive_loss(p, q, z, margin=1.0))
    ref3 = _reference(p, q, z, 1.0)
    assert jnp.allclose(out3, ref3, rtol=1e-3, atol=1e-3), (out3, ref3)

    print("KERNEL_OK")
</pallas_src>

<mosaic_0001>
module attributes {stable_mosaic.version = 11 : i64} {
  func.func @_contrastive_loss_kernel(%arg0: i32, %arg1: i32, %arg2: memref<16x128xf32, #tpu.memory_space<vmem>>, %arg3: memref<16x128xf32, #tpu.memory_space<vmem>>, %arg4: memref<16x4xf32, #tpu.memory_space<vmem>>, %arg5: memref<128x4xf32, #tpu.memory_space<vmem>>, %arg6: memref<1x1x1xf32, #tpu.memory_space<vmem>>) attributes {dimension_semantics = [#tpu.dimension_semantics<parallel>, #tpu.dimension_semantics<arbitrary>], iteration_bounds = array<i64: 2, 1>, scalar_prefetch = 0 : i64, scratch_operands = 0 : i64, tpu.core_type = #tpu.core_type<tc>, window_params = [{transform_indices = @transform_0, window_bounds = array<i64: 16, 128>}, {transform_indices = @transform_1, window_bounds = array<i64: 16, 128>}, {transform_indices = @transform_2, window_bounds = array<i64: 16, 4>}, {pipeline_mode = #tpu.pipeline_mode<synchronous>, transform_indices = @transform_3, window_bounds = array<i64: 128, 4>}, {transform_indices = @transform_4, window_bounds = array<i64: 1, 1, 1>}]} {
    %c0_i32 = arith.constant 0 : i32
    %0 = arith.cmpi eq, %arg1, %c0_i32 : i32
    %1 = arith.extui %0 : i1 to i32
    %c0_i32_0 = arith.constant 0 : i32
    %2 = arith.cmpi ne, %1, %c0_i32_0 : i32
    scf.if %2 {
      %cst_16 = arith.constant 0.000000e+00 : f32
      %33 = vector.broadcast %cst_16 : f32 to vector<1x1x1xf32>
      %c0_17 = arith.constant 0 : index
      %c0_18 = arith.constant 0 : index
      %c0_19 = arith.constant 0 : index
      %34 = vector.load %arg6[%c0_17, %c0_18, %c0_19] : memref<1x1x1xf32, #tpu.memory_space<vmem>>, vector<1x1x1xf32>
      tpu.vector_store %arg6[%c0_17, %c0_18, %c0_19], %33 {strides = array<i32>} : memref<1x1x1xf32, #tpu.memory_space<vmem>>, vector<1x1x1xf32>,
    } else {
    }
    %c0 = arith.constant 0 : index
    %c0_1 = arith.constant 0 : index
    %3 = vector.load %arg2[%c0, %c0_1] : memref<16x128xf32, #tpu.memory_space<vmem>>, vector<16x128xf32>
    %c0_2 = arith.constant 0 : index
    %c0_3 = arith.constant 0 : index
    %4 = vector.load %arg3[%c0_2, %c0_3] : memref<16x128xf32, #tpu.memory_space<vmem>>, vector<16x128xf32>
    %c0_4 = arith.constant 0 : index
    %c0_5 = arith.constant 0 : index
    %5 = vector.load %arg4[%c0_4, %c0_5] : memref<16x4xf32, #tpu.memory_space<vmem>>, vector<16x4xf32>
    %c0_6 = arith.constant 0 : index
    %c0_7 = arith.constant 0 : index
    %6 = vector.load %arg5[%c0_6, %c0_7] : memref<128x4xf32, #tpu.memory_space<vmem>>, vector<128x4xf32>
    %7 = arith.subf %3, %4 : vector<16x128xf32>
    %cst = arith.constant 9.99999997E-7 : f32
    %8 = vector.broadcast %cst : f32 to vector<16x128xf32>
    %9 = arith.addf %7, %8 : vector<16x128xf32>
    %10 = arith.mulf %9, %9 : vector<16x128xf32>
    %cst_8 = arith.constant dense<0.000000e+00> : vector<16x4xf32>
    %11 = tpu.matmul %10, %6, %cst_8 {dimension_numbers = #tpu.dot_dimension_numbers<[1], [0], [0], [1], [0, 0, 1, 1], [], []>, precision = #tpu.contract_precision<fp32>} : vector<16x128xf32>, vector<128x4xf32>, vector<16x4xf32> -> vector<16x4xf32>
    %12 = math.sqrt %11 : vector<16x4xf32>
    %cst_9 = arith.constant 1.000000e+00 : f32
    %13 = vector.broadcast %cst_9 : f32 to vector<16x4xf32>
    %14 = arith.subf %13, %12 : vector<16x4xf32>
    %cst_10 = arith.constant 0.000000e+00 : f32
    %15 = vector.broadcast %cst_10 : f32 to vector<16x4xf32>
    %16 = arith.maximumf %14, %15 : vector<16x4xf32>
    %17 = arith.mulf %5, %11 : vector<16x4xf32>
    %cst_11 = arith.constant 1.000000e+00 : f32
    %18 = vector.broadcast %cst_11 : f32 to vector<16x4xf32>
    %19 = arith.subf %18, %5 : vector<16x4xf32>
    %20 = arith.mulf %16, %16 : vector<16x4xf32>
    %21 = arith.mulf %19, %20 : vector<16x4xf32>
    %22 = arith.addf %17, %21 : vector<16x4xf32>
    %c1_i32 = arith.constant 1 : i32
    %23 = arith.muli %arg0, %c1_i32 : i32
    %24 = arith.addi %23, %arg1 : i32
    %c1_i32_12 = arith.constant 1 : i32
    %25 = arith.addi %24, %c1_i32_12 : i32
    %c64_i32 = arith.constant 64 : i32
    %26 = arith.muli %25, %c64_i32 : i32
    %c64_i32_13 = arith.constant 64 : i32
    %27 = arith.cmpi sgt, %26, %c64_i32_13 : i32
    %28 = arith.extui %27 : i1 to i32
    %c0_i32_14 = arith.constant 0 : i32
    %29 = arith.cmpi ne, %28, %c0_i32_14 : i32
    scf.if %29 {
      %33 = tpu.iota {dimensions = array<i32: 0>} : vector<16x4xi32>
      %34 = tpu.iota {dimensions = array<i32: 1>} : vector<16x4xi32>
      %c16_i32 = arith.constant 16 : i32
      %35 = arith.muli %24, %c16_i32 : i32
      %36 = vector.broadcast %35 : i32 to vector<16x4xi32>
      %37 = arith.addi %36, %33 : vector<16x4xi32>
      %c4_i32 = arith.constant 4 : i32
      %38 = vector.broadcast %c4_i32 : i32 to vector<16x4xi32>
      %39 = arith.muli %37, %38 : vector<16x4xi32>
      %40 = arith.addi %39, %34 : vector<16x4xi32>
      %c64_i32_16 = arith.constant 64 : i32
      %41 = vector.broadcast %c64_i32_16 : i32 to vector<16x4xi32>
      %42 = arith.cmpi slt, %40, %41 : vector<16x4xi32>
      %cst_17 = arith.constant 0.000000e+00 : f32
      %43 = vector.broadcast %cst_17 : f32 to vector<16x4xf32>
      %44 = arith.select %42, %22, %43 : vector<16x4xi1>, vector<16x4xf32>
      %c0_18 = arith.constant 0 : index
      %c0_19 = arith.constant 0 : index
      %c0_20 = arith.constant 0 : index
      %45 = vector.load %arg6[%c0_18, %c0_19, %c0_20] : memref<1x1x1xf32, #tpu.memory_space<vmem>>, vector<1x1x1xf32>
      %46 = vector.shape_cast %44 : vector<16x4xf32> to vector<1x16x4xf32>
      %cst_21 = arith.constant dense<0.000000e+00> : vector<1xf32>
      %47 = vector.multi_reduction <add>, %46, %cst_21 [1, 2] : vector<1x16x4xf32> to vector<1xf32>
      %48 = vector.shape_cast %47 : vector<1xf32> to vector<1x1x1xf32>
      %49 = vector.extract %48[0, 0, 0] : f32 from vector<1x1x1xf32>
      %50 = vector.broadcast %49 : f32 to vector<1x1x1xf32>
      %51 = arith.addf %45, %50 : vector<1x1x1xf32>
      %c0_22 = arith.constant 0 : index
      %c0_23 = arith.constant 0 : index
      %c0_24 = arith.constant 0 : index
      %52 = vector.load %arg6[%c0_22, %c0_23, %c0_24] : memref<1x1x1xf32, #tpu.memory_space<vmem>>, vector<1x1x1xf32>
      tpu.vector_store %arg6[%c0_22, %c0_23, %c0_24], %51 {strides = array<i32>} : memref<1x1x1xf32, #tpu.memory_space<vmem>>, vector<1x1x1xf32>,
    } else {
    }
    %true = arith.constant true
    %30 = arith.xori %27, %true : i1
    %31 = arith.extui %30 : i1 to i32
    %c0_i32_15 = arith.constant 0 : i32
    %32 = arith.cmpi ne, %31, %c0_i32_15 : i32
    scf.if %32 {
      %c0_16 = arith.constant 0 : index
      %c0_17 = arith.constant 0 : index
      %c0_18 = arith.constant 0 : index
      %33 = vector.load %arg6[%c0_16, %c0_17, %c0_18] : memref<1x1x1xf32, #tpu.memory_space<vmem>>, vector<1x1x1xf32>
      %34 = vector.shape_cast %22 : vector<16x4xf32> to vector<1x16x4xf32>
      %cst_19 = arith.constant dense<0.000000e+00> : vector<1xf32>
      %35 = vector.multi_reduction <add>, %34, %cst_19 [1, 2] : vector<1x16x4xf32> to vector<1xf32>
      %36 = vector.shape_cast %35 : vector<1xf32> to vector<1x1x1xf32>
      %37 = vector.extract %36[0, 0, 0] : f32 from vector<1x1x1xf32>
      %38 = vector.broadcast %37 : f32 to vector<1x1x1xf32>
      %39 = arith.addf %33, %38 : vector<1x1x1xf32>
      %c0_20 = arith.constant 0 : index
      %c0_21 = arith.constant 0 : index
      %c0_22 = arith.constant 0 : index
      %40 = vector.load %arg6[%c0_20, %c0_21, %c0_22] : memref<1x1x1xf32, #tpu.memory_space<vmem>>, vector<1x1x1xf32>
      tpu.vector_store %arg6[%c0_20, %c0_21, %c0_22], %39 {strides = array<i32>} : memref<1x1x1xf32, #tpu.memory_space<vmem>>, vector<1x1x1xf32>,
    } else {
    }
    return
  }
  func.func @transform_0(%arg0: i32, %arg1: i32) -> (i32, i32) {
    %c1_i32 = arith.constant 1 : i32
    %0 = arith.muli %arg0, %c1_i32 : i32
    %1 = arith.addi %0, %arg1 : i32
    %c0_i32 = arith.constant 0 : i32
    %2 = arith.minsi %1, %c0_i32 : i32
    %c0_i32_0 = arith.constant 0 : i32
    %c0_i32_1 = arith.constant 0 : i32
    return %2, %c0_i32_0 : i32, i32
  }
  func.func @transform_1(%arg0: i32, %arg1: i32) -> (i32, i32) {
    %c1_i32 = arith.constant 1 : i32
    %0 = arith.muli %arg0, %c1_i32 : i32
    %1 = arith.addi %0, %arg1 : i32
    %c0_i32 = arith.constant 0 : i32
    %2 = arith.minsi %1, %c0_i32 : i32
    %c0_i32_0 = arith.constant 0 : i32
    %c0_i32_1 = arith.constant 0 : i32
    return %2, %c0_i32_0 : i32, i32
  }
  func.func @transform_2(%arg0: i32, %arg1: i32) -> (i32, i32) {
    %c1_i32 = arith.constant 1 : i32
    %0 = arith.muli %arg0, %c1_i32 : i32
    %1 = arith.addi %0, %arg1 : i32
    %c0_i32 = arith.constant 0 : i32
    %2 = arith.minsi %1, %c0_i32 : i32
    %c0_i32_0 = arith.constant 0 : i32
    %c0_i32_1 = arith.constant 0 : i32
    return %2, %c0_i32_0 : i32, i32
  }
  func.func @transform_3(%arg0: i32, %arg1: i32) -> (i32, i32) {
    %c0_i32 = arith.constant 0 : i32
    %c0_i32_0 = arith.constant 0 : i32
    %c0_i32_1 = arith.constant 0 : i32
    return %c0_i32, %c0_i32_0 : i32, i32
  }
  func.func @transform_4(%arg0: i32, %arg1: i32) -> (i32, i32, i32) {
    %c0_i32 = arith.constant 0 : i32
    %c0_i32_0 = arith.constant 0 : i32
    %c0_i32_1 = arith.constant 0 : i32
    return %arg0, %c0_i32, %c0_i32_0 : i32, i32, i32
  }
}

</mosaic_0001>

<bundles_post_ra>
// kernel: tpu_custom_call.1
= control target key start
LH: loop header
LB: loop body
LE: loop exit
PB: predicated region body
PF: predicated region fallthrough
CT: control target
= control target key end

     0   :  { %s1624_s15 = smov 0   ;;  %s1626_s16 = smov 0   ;;  %s2090_s0 = inlined_call_operand.vmem [shape: f32[16,128], index: 0, kind: input, shape index: {}]   ;;  %s2091_s1 = inlined_call_operand.vmem [shape: f32[16,128], index: 1, kind: input, shape index: {}]   ;;  %s2092_s2 = inlined_call_operand.vmem [shape: f32[16,4], index: 2, kind: input, shape index: {}]   ;;  %s2093_s3 = inlined_call_operand.vmem [shape: f32[128,4], index: 3, kind: input, shape index: {}]   ;;  %s2094_s4 = inlined_call_operand.vmem [shape: f32[2,1,1], index: 4, kind: output, shape index: {}]  }
   0x1   :  { %s1628_s17 = smov 0  }
   0x2 LB: > { %s26_s18 = sadd.s32 1, %s1592_s16  ;;  %p1208_p0 = scmp.ge.s32.totalorder %s1596_s17, 1  ;;  %s1596_s17 = sphi %s1628_s17, %s14_s17   ;;  %s1592_s16 = sphi %s1626_s16, %s2098_s16   ;;  %s1588_s15 = sphi %s1624_s15, %s2097_s15  }
   0x3   : > { %p28_p1 = scmp.ge.s32.totalorder %s26_s18, 2  ;;  %p233_p2 = scmp.lt.s32.totalorder %s1596_s17, 3 }
   0x5   : > { %s2100_s18 = smov (%p28_p1, %s26_s18), 0  ;;  %p234_p3 = pnand %p1208_p0, %p233_p2 }
   0x6   : > { %p312_p4 = scmp.lt.s32.totalorder (!%p234_p3), %s1588_s15, 1  ;;  %p277_p5 = scmp.lt.s32.totalorder (!%p234_p3), %s1588_s15, 0 }
   0x7   : > { %237 = sbr.rel (%p234_p3) target bundleno = 784 (0x310), region = 36 }
   0xc   : > { %vm319_vm0 = vcmask 0   ;;  %v342_v0 = vld [vmem:[%s2093_s3 + $0x78] sm:$0xff]  ;;  %v341_v1 = vld [vmem:[%s2093_s3 + $0x70] sm:$0xff]  ;;  %v340_v2 = vld [vmem:[%s2093_s3 + $0x68] sm:$0xff]  ;;  %s313_s5 = scalar_select %p312_p4, %s1588_s15, 1  ;;  %v1598_v21 = vmov 0.0  }
   0xd   : > { %v1654_v3 = vand.u32 4294901760, %v342_v0  ;;  %v1656_v4 = vand.u32 4294901760, %v341_v1  ;;  %v1658_v5 = vand.u32 4294901760, %v340_v2  ;;  %v339_v6 = vld [vmem:[%s2093_s3 + $0x60] sm:$0xff]  ;;  %v338_v7 = vld [vmem:[%s2093_s3 + $0x58] sm:$0xff]  ;;  %v337_v8 = vld [vmem:[%s2093_s3 + $0x50] sm:$0xff] }
   0xe   : > { %v1670_v9 = vand.u32 4294901760, %v339_v6  ;;  %v1672_v10 = vand.u32 4294901760, %v338_v7  ;;  %v1674_v11 = vand.u32 4294901760, %v337_v8  ;;  %v336_v12 = vld [vmem:[%s2093_s3 + $0x48] sm:$0xff]  ;;  %v335_v13 = vld [vmem:[%s2093_s3 + $0x40] sm:$0xff]  ;;  %v334_v18 = vld [vmem:[%s2093_s3 + $0x38] sm:$0xff]  ;;  %s1701_s14 = scalar_lea.vmem %s2094_s4, %s313_s5 }
   0xf   : > { %1331 = vmatprep.subr.mxu0 %v1654_v3  ;;  %v1684_v14 = vsub.f32 %v342_v0, %v1654_v3  ;;  %v1687_v15 = vsub.f32 %v341_v1, %v1656_v4  ;;  %v1689_v16 = vand.u32 4294901760, %v336_v12  ;;  %v1692_v17 = vsub.f32 %v340_v2, %v1658_v5  ;;  %320 = vst.msk [vmem:[%s1701_s14] sm:$0x1] %vm319_vm0, %v1598_v21  ;;  %v333_v26 = vld [vmem:[%s2093_s3 + $0x30] sm:$0xff]  ;;  %s278_s21 = scalar_select %p277_p5, %s1588_s15, 0  ;;  %v332_v36 = vld [vmem:[%s2093_s3 + $0x28] sm:$0xff] }
  0x10   : > { %1332 = vmatpush3.msra.mxu0 %v1654_v3  ;;  %v1705_v19 = vsub.f32 %v339_v6, %v1670_v9  ;;  %v1708_v20 = vsub.f32 %v338_v7, %v1672_v10  ;;  %v1722_v25 = vand.u32 4294901760, %v335_v13  ;;  %v1731_v28 = vand.u32 4294901760, %v334_v18  ;;  %v331_v41 = vld [vmem:[%s2093_s3 + $0x20] sm:$0xff]  ;;  %v330_v49 = vld [vmem:[%s2093_s3 + $0x18] sm:$0xff]  ;;  %v329_v58 = vld [vmem:[%s2093_s3 + $0x10] sm:$0xff] }
  0x11   : > { %1333 = vmatprep.subr.mxu0 %v1656_v4  ;;  %v1714_v22 = vand.u32 4294901760, %v1684_v14  ;;  %v1717_v23 = vand.u32 4294901760, %v1687_v15  ;;  %v1720_v24 = vand.u32 4294901760, %v1692_v17  ;;  %v1737_v30 = vsub.f32 %v337_v8, %v1674_v11  ;;  %s1209_s24 = sshll.u32 %s278_s21, 1  ;;  %v328_v7 = vld [vmem:[%s2093_s3 + $0x8] sm:$0xff]  ;;  %s1221_s21 = sshll.u32 %s1588_s15, 6 }
  0x12   : > { %1334 = vmatpush3.msra.mxu0 %v1656_v4  ;;  %v1729_v27 = vand.u32 4294901760, %v1705_v19  ;;  %v1734_v29 = vand.u32 4294901760, %v1708_v20  ;;  %v1750_v34 = vsub.f32 %v336_v12, %v1689_v16  ;;  %v1753_v35 = vand.u32 4294901760, %v333_v26  ;;  %p280_p6 = scmp.lt.s32.totalorder %s1209_s24, 1  ;;  %s2066_s22 = sadd.s32 64, %s1221_s21 }
  0x13   : > { %1335 = vmatprep.subr.mxu0 %v1658_v5  ;;  %v454_v31 = vsub.f32 %v1684_v14, %v1714_v22  ;;  %v461_v32 = vsub.f32 %v1687_v15, %v1717_v23  ;;  %v468_v33 = vsub.f32 %v1692_v17, %v1720_v24  ;;  %v1762_v40 = vand.u32 4294901760, %v1737_v30  ;;  %p1216_p7 = scmp.le.s32.totalorder %s2066_s22, 64 }
  0x14   : > { %1336 = vmatpush3.msra.mxu0 %v1658_v5  ;;  %v475_v39 = vsub.f32 %v1705_v19, %v1729_v27  ;;  %v1769_v42 = vand.u32 4294901760, %v1750_v34  ;;  %v1772_v43 = vsub.f32 %v335_v13, %v1722_v25  ;;  %v482_v45 = vsub.f32 %v1708_v20, %v1734_v29  ;;  %s2102_s24 = smov (!%p280_p6, %s1209_s24), 1  ;;  %s1217_s26 = sshll.u32 (!%p1216_p7), %s1588_s15, 4 }
  0x15   : > { %1337 = vmatprep.subr.mxu0 %v1670_v9  ;;  %v455_v37 = vand.u32 4294901760, %v454_v31  ;;  %v462_v38 = vand.u32 4294901760, %v461_v32  ;;  %v469_v44 = vand.u32 4294901760, %v468_v33  ;;  %v1777_v46 = vand.u32 4294901760, %v332_v36  ;;  %s1797_s29 = sshll.u32 %s2102_s24, 3  ;;  %v327_v31 = vld [vmem:[%s2093_s3] sm:$0xff] }
  0x16   : > { %1338 = vmatpush3.msra.mxu0 %v1670_v9  ;;  %v1780_v47 = vsub.f32 %v334_v18, %v1731_v28  ;;  %v1783_v48 = vand.u32 4294901760, %v331_v41  ;;  %v476_v50 = vand.u32 4294901760, %v475_v39  ;;  %v489_v51 = vsub.f32 %v1737_v30, %v1762_v40  ;;  %s283_s6 = scalar_lea.vmem %s2090_s0, %s1797_s29  ;;  %s295_s9 = scalar_lea.vmem %s2091_s1, %s1797_s29 }
  0x17   : > { %1339 = vmatprep.subr.mxu0 %v1672_v10  ;;  %1366 = vmatprep.subr.mxu1 %v455_v37  ;;  %v1792_v52 = vand.u32 4294901760, %v1772_v43  ;;  %v1795_v53 = vsub.f32 %v333_v26, %v1753_v35  ;;  %v496_v54 = vsub.f32 %v1750_v34, %v1769_v42  ;;  %v483_v55 = vand.u32 4294901760, %v482_v45  ;;  %v321_v60 = vld [vmem:[%s283_s6] sm:$0xff]  ;;  %v322_v62 = vld [vmem:[%s283_s6 + $0x8] sm:$0xff]  ;;  %s307_s25 = scalar_lea.vmem %s2092_s2, %s1797_s29 }
  0x18   : > { %1340 = vmatpush3.msra.mxu0 %v1672_v10  ;;  %1367 = vmatpush3.msra.mxu1 %v455_v37  ;;  %v1811_v56 = vand.u32 4294901760, %v330_v49  ;;  %v1814_v57 = vand.u32 4294901760, %v1780_v47  ;;  %v1820_v59 = vsub.f32 %v332_v36, %v1777_v46  ;;  %v323_v61 = vld [vmem:[%s295_s9] sm:$0xff]  ;;  %v324_v63 = vld [vmem:[%s295_s9 + $0x8] sm:$0xff]  ;;  %v490_v1 = vand.u32 4294901760, %v489_v51 }
  0x19   : > { %1341 = vmatprep.subr.mxu0 %v1674_v11  ;;  %1368 = vmatprep.subr.mxu1 %v462_v38  ;;  %v343_v0 = vsub.f32 %v321_v60, %v323_v61  ;;  %v503_v2 = vsub.f32 %v1772_v43, %v1792_v52  ;;  %v1827_v6 = vand.u32 4294901760, %v1795_v53  ;;  %v1833_v8 = vsub.f32 %v331_v41, %v1783_v48 }
  0x1a   : > { %1342 = vmatpush3.msra.mxu0 %v1674_v11  ;;  %1369 = vmatpush3.msra.mxu1 %v462_v38  ;;  %v497_v12 = vand.u32 4294901760, %v496_v54  ;;  %v1836_v13 = vand.u32 4294901760, %v329_v58  ;;  %v510_v21 = vsub.f32 %v1780_v47, %v1814_v57  ;;  %v1842_v26 = vand.u32 4294901760, %v1820_v59 }
  0x1b   : > { %1343 = vmatprep.subr.mxu0 %v1689_v16  ;;  %1370 = vmatprep.subr.mxu1 %v469_v44  ;;  %v345_v18 = vadd.f32 1e-06, %v343_v0  ;;  %v1848_v32 = vsub.f32 %v330_v49, %v1811_v56  ;;  %v344_v33 = vsub.f32 %v322_v62, %v324_v63  ;;  %v1851_v36 = vand.u32 4294901760, %v328_v7 }
  0x1c   : > { %1344 = vmatpush3.msra.mxu0 %v1689_v16  ;;  %1371 = vmatpush3.msra.mxu1 %v469_v44  ;;  %v504_v38 = vand.u32 4294901760, %v503_v2  ;;  %v517_v39 = vsub.f32 %v1795_v53, %v1827_v6  ;;  %v1857_v41 = vand.u32 4294901760, %v1833_v8  ;;  %v1860_v45 = vand.u32 4294901760, %v327_v31 }
  0x1d   : > { %1345 = vmatprep.subr.mxu0 %v1722_v25  ;;  %1372 = vmatprep.subr.mxu1 %v476_v50  ;;  %v347_v37 = vmul.f32 %v345_v18, %v345_v18  ;;  %v346_v44 = vadd.f32 1e-06, %v344_v33  ;;  %v511_v51 = vand.u32 4294901760, %v510_v21  ;;  %v524_v54 = vsub.f32 %v1820_v59, %v1842_v26 }
  0x1e   : > { %1346 = vmatpush3.msra.mxu0 %v1722_v25  ;;  %1373 = vmatpush3.msra.mxu1 %v476_v50  ;;  %v1865_v50 = vsub.f32 %v329_v58, %v1836_v13  ;;  %v1878_v58 = vsub.f32 %v328_v7, %v1851_v36  ;;  %v518_v62 = vand.u32 4294901760, %v517_v39  ;;  %v531_v63 = vsub.f32 %v1833_v8, %v1857_v41 }
  0x1f   : > { %1347 = vmatprep.subr.mxu0 %v1731_v28  ;;  %1374 = vmatprep.subr.mxu1 %v483_v55  ;;  %v1862_v49 = vand.u32 4294901760, %v347_v37  ;;  %v348_v60 = vmul.f32 %v346_v44, %v346_v44  ;;  %v1891_v7 = vsub.f32 %v327_v31, %v1860_v45 }
  0x20   : > { %1348 = vmatpush3.msra.mxu0 %v1731_v28  ;;  %1375 = vmatpush3.msra.mxu1 %v483_v55  ;;  %v1871_v55 = vand.u32 4294901760, %v1848_v32  ;;  %v1888_v2 = vand.u32 4294901760, %v1865_v50  ;;  %v1904_v31 = vand.u32 4294901760, %v1878_v58 }
  0x21   : > { %1349 = vmatprep.subr.mxu0 %v1753_v35  ;;  %1376 = vmatprep.subr.mxu1 %v490_v1  ;;  %v1875_v61 = vsub.f32 %v347_v37, %v1862_v49  ;;  %v1883_v0 = vand.u32 4294901760, %v348_v60  ;;  %v532_v37 = vand.u32 4294901760, %v531_v63  ;;  %v1912_v44 = vand.u32 4294901760, %v1891_v7 }
  0x22   : > { %1350 = vmatpush3.msra.mxu0 %v1753_v35  ;;  %1377 = vmatpush3.msra.mxu1 %v490_v1  ;;  %v538_v18 = vsub.f32 %v1848_v32, %v1871_v55  ;;  %v545_v39 = vsub.f32 %v1865_v50, %v1888_v2 }
  0x23   : > { %1351 = vmatprep.subr.mxu0 %v1777_v46  ;;  %1378 = vmatprep.subr.mxu1 %v497_v12  ;;  %v2095_v1 = vand.u32 4294901760, %v1875_v61  ;;  %v1897_v21 = vsub.f32 %v348_v60, %v1883_v0 }
  0x24   : > { %1352 = vmatpush3.msra.mxu0 %v1777_v46  ;;  %1379 = vmatpush3.msra.mxu1 %v497_v12  ;;  %v525_v12 = vand.u32 4294901760, %v524_v54  ;;  %v539_v54 = vand.u32 4294901760, %v538_v18  ;;  %v559_v18 = vsub.f32 %v1891_v7, %v1912_v44 }
  0x25   : > { %1353 = vmatprep.subr.mxu0 %v1783_v48  ;;  %1380 = vmatprep.subr.mxu1 %v504_v38  ;;  %v433_v33 = vsub.f32 %v1875_v61, %v2095_v1  ;;  %v546_v1 = vand.u32 4294901760, %v545_v39 }
  0x26   : > { %1354 = vmatpush3.msra.mxu0 %v1783_v48  ;;  %1381 = vmatpush3.msra.mxu1 %v504_v38  ;;  %v442_v38 = vand.u32 4294901760, %v1897_v21 }
  0x27   : > { %1355 = vmatprep.subr.mxu0 %v1811_v56  ;;  %1382 = vmatprep.subr.mxu1 %v511_v51 }
  0x28   : > { %1356 = vmatpush3.msra.mxu0 %v1811_v56  ;;  %1383 = vmatpush3.msra.mxu1 %v511_v51  ;;  %v434_v51 = vand.u32 4294901760, %v433_v33  ;;  %v443_v60 = vsub.f32 %v1897_v21, %v442_v38  ;;  %v560_v33 = vand.u32 4294901760, %v559_v18 }
  0x29   : > { %1357 = vmatprep.subr.mxu0 %v1836_v13  ;;  %1384 = vmatprep.subr.mxu1 %v518_v62 }
  0x2a   : > { %1358 = vmatpush3.msra.mxu0 %v1836_v13  ;;  %1385 = vmatpush3.msra.mxu1 %v518_v62  ;;  %v552_v62 = vsub.f32 %v1878_v58, %v1904_v31  ;;  %v444_v63 = vand.u32 4294901760, %v443_v60 }
  0x2b   : > { %1359 = vmatprep.subr.mxu0 %v1851_v36  ;;  %1386 = vmatprep.subr.mxu1 %v525_v12 }
  0x2c   : > { %1360 = vmatpush3.msra.mxu0 %v1851_v36  ;;  %1387 = vmatpush3.msra.mxu1 %v525_v12  ;;  %v553_v12 = vand.u32 4294901760, %v552_v62 }
  0x2d   : > { %1361 = vmatprep.subr.mxu0 %v1860_v45  ;;  %1388 = vmatprep.subr.mxu1 %v532_v37 }
  0x2e   : > { %1362 = vmatpush3.msra.mxu0 %v1860_v45  ;;  %1389 = vmatpush3.msra.mxu1 %v532_v37 }
  0x2f   : > { %1363 = vmatprep.mubr.f32.mxu0 %v434_v51  ;;  %1390 = vmatprep.subr.mxu1 %v539_v54 }
  0x30   : > { %1401 = vmatprep.subr.mxu0 %v1684_v14  ;;  %1364 = vmatmul.mubr.f32.vlgmr.msra.gmra.mxu0 %v444_v63 }
  0x31   : > { %1391 = vmatpush3.msra.mxu1 %v539_v54  ;;  %1402 = vmatpush3.msra.mxu0 %v1684_v14  ;;  %v2096_v14 = vand.u32 4294901760, %v1875_v61 }
  0x32   : > { %1392 = vmatprep.subr.mxu1 %v546_v1  ;;  %1403 = vmatprep.subr.mxu0 %v1687_v15 }
  0x33   : > { %1393 = vmatpush3.msra.mxu1 %v546_v1  ;;  %1404 = vmatpush3.msra.mxu0 %v1687_v15 }
  0x34   : > { %1394 = vmatprep.subr.mxu1 %v553_v12  ;;  %1405 = vmatprep.subr.mxu0 %v1692_v17 }
  0x35   : > { %1395 = vmatpush3.msra.mxu1 %v553_v12  ;;  %1406 = vmatpush3.msra.mxu0 %v1692_v17 }
  0x36   : > { %1396 = vmatprep.subr.mxu1 %v560_v33  ;;  %1407 = vmatprep.subr.mxu0 %v1705_v19 }
  0x37   : > { %1397 = vmatpush3.msra.mxu1 %v560_v33  ;;  %1398 = vmatprep.mubr.f32.mxu1 %v1862_v49 }
  0x38   : > { %1408 = vmatpush3.msra.mxu0 %v1705_v19  ;;  %1399 = vmatmul.mubr.f32.vlgmr.msra.gmra.mxu1 %v1883_v0 }
  0x39   : > { %1409 = vmatprep.subr.mxu0 %v1708_v20  ;;  %1436 = vmatprep.subr.mxu1 %v1654_v3 }
  0x3a   : > { %1410 = vmatpush3.msra.mxu0 %v1708_v20  ;;  %1437 = vmatpush3.msra.mxu1 %v1654_v3 }
  0x3b   : > { %1411 = vmatprep.subr.mxu0 %v1737_v30  ;;  %1438 = vmatprep.subr.mxu1 %v1656_v4 }
  0x3c   : > { %1412 = vmatpush3.msra.mxu0 %v1737_v30  ;;  %1439 = vmatpush3.msra.mxu1 %v1656_v4 }
  0x3d   : > { %1413 = vmatprep.subr.mxu0 %v1750_v34  ;;  %1440 = vmatprep.subr.mxu1 %v1658_v5 }
  0x3e   : > { %1414 = vmatpush3.msra.mxu0 %v1750_v34  ;;  %1441 = vmatpush3.msra.mxu1 %v1658_v5 }
  0x3f   : > { %1415 = vmatprep.subr.mxu0 %v1772_v43  ;;  %1442 = vmatprep.subr.mxu1 %v1670_v9 }
  0x40   : > { %1416 = vmatpush3.msra.mxu0 %v1772_v43  ;;  %1443 = vmatpush3.msra.mxu1 %v1670_v9 }
  0x41   : > { %1417 = vmatprep.subr.mxu0 %v1780_v47  ;;  %1444 = vmatprep.subr.mxu1 %v1672_v10 }
  0x42   : > { %1418 = vmatpush3.msra.mxu0 %v1780_v47  ;;  %1445 = vmatpush3.msra.mxu1 %v1672_v10 }
  0x43   : > { %1419 = vmatprep.subr.mxu0 %v1795_v53  ;;  %1446 = vmatprep.subr.mxu1 %v1674_v11 }
  0x44   : > { %1420 = vmatpush3.msra.mxu0 %v1795_v53  ;;  %1447 = vmatpush3.msra.mxu1 %v1674_v11 }
  0x45   : > { %1421 = vmatprep.subr.mxu0 %v1820_v59  ;;  %1448 = vmatprep.subr.mxu1 %v1689_v16 }
  0x46   : > { %1422 = vmatpush3.msra.mxu0 %v1820_v59  ;;  %1449 = vmatpush3.msra.mxu1 %v1689_v16  ;;  %v326_v59 = vld [vmem:[%s307_s25 + $0x8] sm:$0xff] }
  0x47   : > { %1423 = vmatprep.subr.mxu0 %v1833_v8  ;;  %1450 = vmatprep.subr.mxu1 %v1722_v25 }
  0x48   : > { %1424 = vmatpush3.msra.mxu0 %v1833_v8  ;;  %1451 = vmatpush3.msra.mxu1 %v1722_v25  ;;  %v1054_v8 = vsub.f32 1.0, %v326_v59 }
  0x49   : > { %1425 = vmatprep.subr.mxu0 %v1848_v32  ;;  %1452 = vmatprep.subr.mxu1 %v1731_v28 }
  0x4a   : > { %1426 = vmatpush3.msra.mxu0 %v1848_v32  ;;  %1453 = vmatpush3.msra.mxu1 %v1731_v28 }
  0x4b   : > { %1427 = vmatprep.subr.mxu0 %v1865_v50  ;;  %1454 = vmatprep.subr.mxu1 %v1753_v35 }
  0x4c   : > { %1428 = vmatpush3.msra.mxu0 %v1865_v50  ;;  %1455 = vmatpush3.msra.mxu1 %v1753_v35 }
  0x4d   : > { %1429 = vmatprep.subr.mxu0 %v1878_v58  ;;  %1456 = vmatprep.subr.mxu1 %v1777_v46 }
  0x4e   : > { %1430 = vmatpush3.msra.mxu0 %v1878_v58  ;;  %1457 = vmatpush3.msra.mxu1 %v1777_v46 }
  0x4f   : > { %1431 = vmatprep.subr.mxu0 %v1891_v7  ;;  %1458 = vmatprep.subr.mxu1 %v1783_v48 }
  0x50   : > { %1432 = vmatpush3.msra.mxu0 %v1891_v7  ;;  %1433 = vmatprep.mubr.f32.mxu0 %v1875_v61 }
  0x51   : > { %1459 = vmatpush3.msra.mxu1 %v1783_v48  ;;  %1434 = vmatmul.mubr.f32.vlgmr.msra.gmra.mxu0 %v1897_v21 }
  0x52   : > { %1460 = vmatprep.subr.mxu1 %v1811_v56  ;;  %1471 = vmatprep.subr.mxu0 %v1714_v22 }
  0x53   : > { %1461 = vmatpush3.msra.mxu1 %v1811_v56  ;;  %1472 = vmatpush3.msra.mxu0 %v1714_v22 }
  0x54   : > { %1462 = vmatprep.subr.mxu1 %v1836_v13  ;;  %1473 = vmatprep.subr.mxu0 %v1717_v23 }
  0x55   : > { %1463 = vmatpush3.msra.mxu1 %v1836_v13  ;;  %1474 = vmatpush3.msra.mxu0 %v1717_v23 }
  0x56   : > { %1464 = vmatprep.subr.mxu1 %v1851_v36  ;;  %1475 = vmatprep.subr.mxu0 %v1720_v24 }
  0x57   : > { %1465 = vmatpush3.msra.mxu1 %v1851_v36  ;;  %1476 = vmatpush3.msra.mxu0 %v1720_v24 }
  0x58   : > { %1466 = vmatprep.subr.mxu1 %v1860_v45  ;;  %1477 = vmatprep.subr.mxu0 %v1729_v27 }
  0x59   : > { %1467 = vmatpush3.msra.mxu1 %v1860_v45  ;;  %1468 = vmatprep.mubr.f32.mxu1 %v2096_v14 }
  0x5a   : > { %1478 = vmatpush3.msra.mxu0 %v1729_v27  ;;  %1469 = vmatmul.mubr.f32.vlgmr.msra.gmra.mxu1 %v442_v38 }
  0x5b   : > { %1479 = vmatprep.subr.mxu0 %v1734_v29  ;;  %1506 = vmatprep.subr.mxu1 %v1654_v3 }
  0x5c   : > { %1480 = vmatpush3.msra.mxu0 %v1734_v29  ;;  %1507 = vmatpush3.msra.mxu1 %v1654_v3 }
  0x5d   : > { %1481 = vmatprep.subr.mxu0 %v1762_v40  ;;  %1508 = vmatprep.subr.mxu1 %v1656_v4 }
  0x5e   : > { %1482 = vmatpush3.msra.mxu0 %v1762_v40  ;;  %1509 = vmatpush3.msra.mxu1 %v1656_v4 }
  0x5f   : > { %1483 = vmatprep.subr.mxu0 %v1769_v42  ;;  %1510 = vmatprep.subr.mxu1 %v1658_v5 }
  0x60   : > { %1484 = vmatpush3.msra.mxu0 %v1769_v42  ;;  %1511 = vmatpush3.msra.mxu1 %v1658_v5 }
  0x61   : > { %1485 = vmatprep.subr.mxu0 %v1792_v52  ;;  %1512 = vmatprep.subr.mxu1 %v1670_v9 }
  0x62   : > { %1486 = vmatpush3.msra.mxu0 %v1792_v52  ;;  %1513 = vmatpush3.msra.mxu1 %v1670_v9 }
  0x63   : > { %1487 = vmatprep.subr.mxu0 %v1814_v57  ;;  %1514 = vmatprep.subr.mxu1 %v1672_v10 }
  0x64   : > { %1488 = vmatpush3.msra.mxu0 %v1814_v57  ;;  %1515 = vmatpush3.msra.mxu1 %v1672_v10 }
  0x65   : > { %1489 = vmatprep.subr.mxu0 %v1827_v6  ;;  %1516 = vmatprep.subr.mxu1 %v1674_v11 }
  0x66   : > { %1490 = vmatpush3.msra.mxu0 %v1827_v6  ;;  %1517 = vmatpush3.msra.mxu1 %v1674_v11 }
  0x67   : > { %1491 = vmatprep.subr.mxu0 %v1842_v26  ;;  %1518 = vmatprep.subr.mxu1 %v1689_v16 }
  0x68   : > { %1492 = vmatpush3.msra.mxu0 %v1842_v26  ;;  %1519 = vmatpush3.msra.mxu1 %v1689_v16 }
  0x69   : > { %1493 = vmatprep.subr.mxu0 %v1857_v41  ;;  %1520 = vmatprep.subr.mxu1 %v1722_v25 }
  0x6a   : > { %1494 = vmatpush3.msra.mxu0 %v1857_v41  ;;  %1521 = vmatpush3.msra.mxu1 %v1722_v25 }
  0x6b   : > { %1495 = vmatprep.subr.mxu0 %v1871_v55  ;;  %1522 = vmatprep.subr.mxu1 %v1731_v28 }
  0x6c   : > { %1496 = vmatpush3.msra.mxu0 %v1871_v55  ;;  %1523 = vmatpush3.msra.mxu1 %v1731_v28 }
  0x6d   : > { %1497 = vmatprep.subr.mxu0 %v1888_v2  ;;  %1524 = vmatprep.subr.mxu1 %v1753_v35 }
  0x6e   : > { %1498 = vmatpush3.msra.mxu0 %v1888_v2  ;;  %1525 = vmatpush3.msra.mxu1 %v1753_v35 }
  0x6f   : > { %1499 = vmatprep.subr.mxu0 %v1904_v31  ;;  %1526 = vmatprep.subr.mxu1 %v1777_v46 }
  0x70   : > { %1500 = vmatpush3.msra.mxu0 %v1904_v31  ;;  %1527 = vmatpush3.msra.mxu1 %v1777_v46 }
  0x71   : > { %1501 = vmatprep.subr.mxu0 %v1912_v44  ;;  %1528 = vmatprep.subr.mxu1 %v1783_v48 }
  0x72   : > { %1502 = vmatpush3.msra.mxu0 %v1912_v44  ;;  %1503 = vmatprep.mubr.f32.mxu0 %v1862_v49 }
  0x73   : > { %1529 = vmatpush3.msra.mxu1 %v1783_v48  ;;  %1504 = vmatmul.mubr.f32.vlgmr.msra.gmra.mxu0 %v1883_v0 }
  0x74   : > { %1530 = vmatprep.subr.mxu1 %v1811_v56  ;;  %1538 = vmatprep.mubr.f32.mxu1 %v1862_v49 }
  0x75   : > { %1531 = vmatpush3.msra.mxu1 %v1811_v56 }
  0x76   : > { %1532 = vmatprep.subr.mxu1 %v1836_v13 }
  0x77   : > { %1533 = vmatpush3.msra.mxu1 %v1836_v13 }
  0x78   : > { %1534 = vmatprep.subr.mxu1 %v1851_v36 }
  0x79   : > { %1535 = vmatpush3.msra.mxu1 %v1851_v36  ;;  %v325_v36 = vld [vmem:[%s307_s25] sm:$0xff] }
  0x7a   : > { %1536 = vmatprep.subr.mxu1 %v1860_v45 }
  0x7b   : > { %1537 = vmatpush3.msra.mxu1 %v1860_v45  ;;  %v1053_v45 = vsub.f32 1.0, %v325_v36 }
  0x7c   : > { %1539 = vmatmul.mubr.f32.vlgmr.msra.gmra.mxu1 %v1883_v0 }
  0xf0   : > { %v1365_v3 = vpop.f32.mrf.mxu0 }
  0xf2   : > { %v436_v4 = vpop.f32.mrf.mxu0 }
  0xf8   : > { %v1400_v5 = vpop.f32.mrf.mxu1 }
  0xf9   : > { %v604_v11 = vadd.f32 %v1400_v5, %v1365_v3 }
  0xfa   : > { %v597_v10 = vpop.f32.mrf.mxu1 }
  0xfb   : > { %v598_v20 = vadd.f32 %v597_v10, %v436_v4 }
 0x111   : > { %v1435_v9 = vpop.f32.mrf.mxu0 }
 0x112   : > { %v715_v17 = vadd.f32 %v1435_v9, %v604_v11 }
 0x113   : > { %v707_v15 = vpop.f32.mrf.mxu0 }
 0x114   : > { %v708_v24 = vadd.f32 %v707_v15, %v598_v20 }
 0x11a   : > { %v1470_v16 = vpop.f32.mrf.mxu1 }
 0x11b   : > { %v812_v22 = vadd.f32 %v1470_v16, %v715_v17 }
 0x11c   : > { %v803_v23 = vpop.f32.mrf.mxu1 }
 0x11d   : > { %v804_v28 = vadd.f32 %v803_v23, %v708_v24 }
 0x133   : > { %v1505_v19 = vpop.f32.mrf.mxu0 }
 0x134   : > { %v937_v25 = vadd.f32 %v1505_v19, %v812_v22 }
 0x135   : > { %v930_v27 = vpop.f32.mrf.mxu0 }
 0x136   : > { %v931_v34 = vadd.f32 %v930_v27, %v804_v28 }
 0x13c   : > { %v1540_v29 = vpop.f32.mrf.mxu1 }
 0x13d   : > { %v1030_v30 = vadd.f32 %v1540_v29, %v937_v25 }
 0x13e   : > { %v1023_v35 = vpop.f32.mrf.mxu1 }
 0x13f   : > { %1570 = vrsqrt.f32 %v1030_v30  ;;  %v1024_v40 = vadd.f32 %v1023_v35, %v931_v34  ;;  %vm1042_vm1 = vcmp.eq.f32.partialorder %v1030_v30, inf  ;;  %v1045_v46 = vand.u32 2147483648, %v1030_v30 }
 0x140   : > { %vm1044_vm2 = vcmp.eq.f32.partialorder %v1030_v30, 0.0  ;;  %v1052_v50 = vmul.f32 %v1030_v30, %v326_v59 }
 0x141   : > { %1572 = vrsqrt.f32 %v1024_v40  ;;  %vm1035_vm3 = vcmp.eq.f32.partialorder %v1024_v40, inf  ;;  %v1038_v57 = vand.u32 2147483648, %v1024_v40  ;;  %vm1037_vm4 = vcmp.eq.f32.partialorder %v1024_v40, 0.0 }
 0x142   : > { %v1051_v0 = vmul.f32 %v1024_v40, %v325_v36 }
 0x14c   : > { %v1571_v42 = vpop.eup %1570 }
 0x14d   : > { %v1041_v43 = vmul.f32 %v1571_v42, %v1030_v30 }
 0x14e   : > { %v1573_v47 = vpop.eup %1572 }
 0x14f   : > { %v1043_v48 = vsel %vm1042_vm1, %v1030_v30, %v1041_v43  ;;  %v1034_v53 = vmul.f32 %v1573_v47, %v1024_v40 }
 0x150   : > { %v1046_v52 = vsel %vm1044_vm2, %v1045_v46, %v1043_v48 }
 0x151   : > { %v1048_v56 = vsub.f32 1.0, %v1046_v52  ;;  %v1036_v6 = vsel %vm1035_vm3, %v1024_v40, %v1034_v53 }
 0x152   : > { %v1039_v26 = vsel %vm1037_vm4, %v1038_v57, %v1036_v6 }
 0x153   : > { %v1050_v13 = vmax.f32 %v1048_v56, 0.0  ;;  %v1047_v32 = vsub.f32 1.0, %v1039_v26 }
 0x155   : > { %v1056_v41 = vmul.f32 %v1050_v13, %v1050_v13  ;;  %v1049_v49 = vmax.f32 %v1047_v32, 0.0 }
 0x157   : > { %v1058_v55 = vmul.f32 %v1056_v41, %v1054_v8  ;;  %v1055_v61 = vmul.f32 %v1049_v49, %v1049_v49  ;;  %1067 = sbr.rel (%p1216_p7) target bundleno = 569 (0x239), region = 44 }
 0x159   : > { %v1060_v58 = vadd.f32 %v1058_v55, %v1052_v50  ;;  %v1057_v1 = vmul.f32 %v1055_v61, %v1053_v45 }
 0x15b   : > { %v1059_v2 = vadd.f32 %v1057_v1, %v1051_v0 }
 0x15c   : > { %v1068_v7 = vlaneseq  ;;  %v1074_v21 = vstv %s1217_s26  ;;  %vm1086_vm5 = vcmask 31744   ;;  %v1085_v16 = vld [vmem:[%s1701_s14] sm:$0x1] }
 0x15e   : > { %v1069_v31 = vshrl.u32 %v1068_v7, 7  ;;  %v1072_v38 = vand.u32 127, %v1068_v7 }
 0x160   : > { %v1070_v37 = vadd.s32 8, %v1069_v31  ;;  %v1075_v39 = vadd.s32 %v1074_v21, %v1069_v31 }
 0x162   : > { %v1076_v44 = vadd.s32 %v1074_v21, %v1070_v37  ;;  %v1077_v51 = vmul.u32 4, %v1075_v39 }
 0x164   : > { %v1078_v54 = vmul.u32 4, %v1076_v44  ;;  %v1079_v60 = vadd.s32 %v1077_v51, %v1072_v38 }
 0x166   : > { %v1080_v62 = vadd.s32 %v1078_v54, %v1072_v38  ;;  %vm1081_vm6 = vcmp.lt.s32.totalorder %v1079_v60, 64 }
 0x167   : > { %v1083_v63 = vsel %vm1081_vm6, %v1059_v2, 0.0 }
 0x168   : > { %vm1082_vm7 = vcmp.lt.s32.totalorder %v1080_v62, 64  ;;  %v1087_v18 = vsel %vm1086_vm5, %v1083_v63, 0.0 }
 0x169   : > { %v1084_v12 = vsel %vm1082_vm7, %v1060_v58, 0.0 }
 0x16a   : > { %v1088_v33 = vsel %vm1086_vm5, %v1084_v12, 0.0 }
 0x16b   : > { %v1089_v14 = vadd.f32 %v1088_v33, %v1087_v18 }
 0x16d   : > { %1090 = vadd.xlane.f32.xlu0 %v1089_v14 }
 0x1f6   : > { %v1091_v3 = vpop.xlane.xlu0 %1090 }
 0x1f7   : > { %v1092_v4 = vrot.slane %v1091_v3, 4 }
 0x1f9   : > { %v1093_v5 = vadd.f32 %v1092_v4, %v1091_v3 }
 0x1fb   : > { %v1094_v9 = vrot.slane %v1093_v5, 2 }
 0x1fd   : > { %v1095_v10 = vadd.f32 %v1094_v9, %v1093_v5 }
 0x1ff   : > { %v1096_v11 = vrot.slane %v1095_v10, 1 }
 0x201   : > { %v1097_v15 = vadd.f32 %v1096_v11, %v1095_v10 }
 0x203   : > { %1541 = vpush %v1097_v15 }
 0x234   : > { %s1542_s15 = spop %1541 }
 0x235   : > { %v1099_v17 = vstv %s1542_s15 }
 0x236   : > { %v1100_v19 = vadd.f32 %v1099_v17, %v1085_v16 }
 0x238   : > { %1102 = vst.msk [vmem:[%s1701_s14] sm:$0x1] %vm319_vm0, %v1100_v19 }
 0x239 PF: > { %p1218_p8 = scmp.gt.s32.totalorder %s2066_s22, 64 }
 0x23b   : > { %1106 = sbr.rel (%p1218_p8) target bundleno = 784 (0x310), region = 48 }
 0x240   : > { %vm1108_vm8 = vcmask 31744   ;;  %v1107_v35 = vld [vmem:[%s1701_s14] sm:$0x1] }
 0x241   : > { %v1109_v20 = vsel %vm1108_vm8, %v1059_v2, 0.0  ;;  %v1110_v22 = vsel %vm1108_vm8, %v1060_v58, 0.0 }
 0x242   : > { %v1111_v23 = vadd.f32 %v1110_v22, %v1109_v20 }
 0x244   : > { %1112 = vadd.xlane.f32.xlu0 %v1111_v23 }
 0x2cd   : > { %v1113_v24 = vpop.xlane.xlu0 %1112 }
 0x2ce   : > { %v1114_v25 = vrot.slane %v1113_v24, 4 }
 0x2d0   : > { %v1115_v27 = vadd.f32 %v1114_v25, %v1113_v24 }
 0x2d2   : > { %v1116_v28 = vrot.slane %v1115_v27, 2 }
 0x2d4   : > { %v1117_v29 = vadd.f32 %v1116_v28, %v1115_v27 }
 0x2d6   : > { %v1118_v30 = vrot.slane %v1117_v29, 1 }
 0x2d8   : > { %v1119_v34 = vadd.f32 %v1118_v30, %v1117_v29 }
 0x2da   : > { %1543 = vpush %v1119_v34 }
 0x30b   : > { %s1544_s27 = spop %1543 }
 0x30c   : > { %v1121_v40 = vstv %s1544_s27 }
 0x30d   : > { %v1122_v42 = vadd.f32 %v1121_v40, %v1107_v35 }
 0x30f   : > { %1124 = vst.msk [vmem:[%s1701_s14] sm:$0x1] %vm319_vm0, %v1122_v42 }
 0x310 PF: > { %s14_s17 = sadd.s32 1, %s1596_s17   ;;  %s2097_s15 = smov %s1592_s16 }
 0x311   : > { %p11_p9 = scmp.ge.s32.totalorder %s14_s17, 4   ;;  %s2098_s16 = smov %s2100_s18 }
 0x313   :  { %13 = sbr.rel (!%p11_p9) target bundleno = 2 (0x2), region = 84 }

</bundles_post_ra>
